<compile_context>
chip_gen: v7x
topology: tpu7x:2x2x1
jax: 0.10.0
libtpu: 0.0.40
codegen_flags: <defaults>
</compile_context>

<pallas_src>
import jax
import jax.numpy as jnp
from jax.experimental import pallas as pl
from jax.experimental.pallas import tpu as pltpu


def _classhead_kernel(x_ref, w_ref, b_ref, o_ref):
    # x_ref: (nb, C, T)  -- channels on sublanes, spatial on lanes
    # w_ref: (O, C)      -- resident (constant block index across the grid)
    # b_ref: (O, 1)      -- f32, broadcast along lanes
    # o_ref: (nb, O, T)  -- lane-dense store (T is a multiple of 128)
    w = w_ref[...]
    b = b_ref[...]
    for bi in range(x_ref.shape[0]):            # nb is small & static -> unrolled
        acc = jnp.dot(w, x_ref[bi], preferred_element_type=jnp.float32)
        o_ref[bi] = (acc + b).astype(o_ref.dtype)


def _cdiv(a, b):
    return -(-a // b)


def _round_up(x, m):
    return (x + m - 1) // m * m


def _choose_blocks(N, C, O, HW, itemsize, vmem_budget_bytes=12 << 20):
    """Pick (batch_block nb, spatial tile_hw).

    One grid step should cover as much data as fits a conservative VMEM budget
    (double-buffered input + output), while keeping >= 2 grid steps whenever
    possible so both v7x TensorCores get work.
    """
    hw_pad = _round_up(HW, 128)
    col_bytes = 2 * (C + O) * itemsize                       # double-buffered, per column
    max_cols = max(128, (vmem_budget_bytes // col_bytes) // 128 * 128)

    tile_hw = min(hw_pad, max_cols)                          # whole image if it fits
    nb = 1
    if tile_hw >= hw_pad:                                    # spatial covered by one tile
        nb = max(1, min(N, max_cols // hw_pad))              # amortize per-step overhead

    if _cdiv(N, nb) * _cdiv(HW, tile_hw) < 2:                # keep >= 2 steps (v7x megacore)
        if N >= 2:
            nb = _cdiv(N, 2)
        elif HW > 128:
            tile_hw = _round_up(_cdiv(HW, 2), 128)
    return nb, tile_hw


def class_head_forward(x_nchw, weight, bias, num_anchors=2):
    """x_nchw: (N, C, H, W); weight: (O, C, 1, 1) PyTorch conv layout; bias: (O,)."""
    N, C, H, W = x_nchw.shape
    O = weight.shape[0]
    assert O == num_anchors * 2
    HW = H * W

    # Metadata-only reshape: H, W are contiguous in NCHW -> no extra HBM pass.
    x3d = x_nchw.reshape(N, C, HW)
    w2d = weight.reshape(O, C).astype(x_nchw.dtype)   # tiny; lets bf16 x use native MXU path
    b2d = bias.reshape(O, 1).astype(jnp.float32)      # bias added to the f32 accumulator

    itemsize = jnp.dtype(x_nchw.dtype).itemsize
    nb, tile_hw = _choose_blocks(N, C, O, HW, itemsize)
    grid = (_cdiv(N, nb), _cdiv(HW, tile_hw))

    cost = pl.CostEstimate(
        flops=2 * N * HW * C * O,
        transcendentals=0,
        bytes_accessed=N * HW * (C + O) * itemsize + O * C * itemsize + O * 4,
    )

    out3d = pl.pallas_call(
        _classhead_kernel,
        out_shape=jax.ShapeDtypeStruct((N, O, HW), x_nchw.dtype),
        grid_spec=pltpu.PrefetchScalarGridSpec(
            num_scalar_prefetch=0,
            grid=grid,
            in_specs=[
                pl.BlockSpec((nb, C, tile_hw), lambda i, j: (i, 0, j)),
                pl.BlockSpec((O, C), lambda i, j: (0, 0)),
                pl.BlockSpec((O, 1), lambda i, j: (0, 0)),
            ],
            out_specs=pl.BlockSpec((nb, O, tile_hw), lambda i, j: (i, 0, j)),
        ),
        compiler_params=pltpu.CompilerParams(
            dimension_semantics=("parallel", "parallel"),
        ),
        cost_estimate=cost,
    )(x3d, w2d, b2d)

    # (N, O, HW) -> (N, HW, O): only 2*O/C of the input traffic; keep it in the
    # same jit as downstream consumers (softmax/concat) so XLA fuses it.
    out_nhwc = jnp.transpose(out3d, (0, 2, 1))
    # Matches permute(0,2,3,1).contiguous().view(N, -1, 2) (row-major).
    return out_nhwc.reshape(N, HW * num_anchors, 2)


def class_head_reference(x_nchw, weight, bias, num_anchors=2):
    """Pure-JAX reference mirroring the PyTorch forward."""
    N, C, H, W = x_nchw.shape
    O = weight.shape[0]
    w2d = weight.reshape(O, C)
    out = jnp.einsum("nchw,oc->nohw", x_nchw, w2d) + bias[None, :, None, None]
    out = jnp.transpose(out, (0, 2, 3, 1))       # NHWC
    return out.reshape(N, -1, 2)


if __name__ == "__main__":
    num_anchors = 2
    O = num_anchors * 2
    key = jax.random.PRNGKey(0)

    fwd = jax.jit(class_head_forward, static_argnames=("num_anchors",))

    # Case 1: lane-aligned spatial extent (HW = 256).
    # Case 2: non-128-multiple spatial extent (HW = 400) -> ragged last tile (no pad).
    # Case 3: N = 1 -> spatial axis is split so the grid keeps 2 parallel steps.
    for (N, C, H, W) in [(2, 64, 16, 16), (2, 64, 20, 20), (1, 32, 20, 20)]:
        kx, kw, kb, key = jax.random.split(key, 4)
        x = jax.random.normal(kx, (N, C, H, W), dtype=jnp.float32)
        weight = jax.random.normal(kw, (O, C, 1, 1), dtype=jnp.float32) * 0.05
        bias = jax.random.normal(kb, (O,), dtype=jnp.float32) * 0.05

        out = jax.block_until_ready(fwd(x, weight, bias, num_anchors=num_anchors))
        ref = class_head_reference(x, weight, bias, num_anchors=num_anchors)
        assert out.shape == (N, H * W * num_anchors, 2), out.shape
        assert jnp.allclose(out, ref, atol=1e-3, rtol=1e-3), "mismatch vs reference"

    print("KERNEL_OK")
</pallas_src>

<mosaic_0001>
module attributes {stable_mosaic.version = 11 : i64} {
  func.func @_classhead_kernel(%arg0: i32, %arg1: i32, %arg2: memref<1x64x256xf32, #tpu.memory_space<vmem>>, %arg3: memref<4x64xf32, #tpu.memory_space<vmem>>, %arg4: memref<4x1xf32, #tpu.memory_space<vmem>>, %arg5: memref<1x4x256xf32, #tpu.memory_space<vmem>>) attributes {dimension_semantics = [#tpu.dimension_semantics<parallel>, #tpu.dimension_semantics<parallel>], iteration_bounds = array<i64: 2, 1>, scalar_prefetch = 0 : i64, scratch_operands = 0 : i64, tpu.core_type = #tpu.core_type<tc>, window_params = [{transform_indices = @transform_0, window_bounds = array<i64: 1, 64, 256>}, {pipeline_mode = #tpu.pipeline_mode<synchronous>, transform_indices = @transform_1, window_bounds = array<i64: 4, 64>}, {pipeline_mode = #tpu.pipeline_mode<synchronous>, transform_indices = @transform_2, window_bounds = array<i64: 4, 1>}, {transform_indices = @transform_3, window_bounds = array<i64: 1, 4, 256>}]} {
    %c0 = arith.constant 0 : index
    %c0_0 = arith.constant 0 : index
    %0 = vector.load %arg3[%c0, %c0_0] : memref<4x64xf32, #tpu.memory_space<vmem>>, vector<4x64xf32>
    %c0_1 = arith.constant 0 : index
    %c0_2 = arith.constant 0 : index
    %1 = vector.load %arg4[%c0_1, %c0_2] : memref<4x1xf32, #tpu.memory_space<vmem>>, vector<4x1xf32>
    %c0_3 = arith.constant 0 : index
    %c0_4 = arith.constant 0 : index
    %c0_5 = arith.constant 0 : index
    %2 = vector.load %arg2[%c0_3, %c0_4, %c0_5] : memref<1x64x256xf32, #tpu.memory_space<vmem>>, vector<1x64x256xf32>
    %3 = vector.shape_cast %2 : vector<1x64x256xf32> to vector<64x256xf32>
    %cst = arith.constant dense<0.000000e+00> : vector<4x256xf32>
    %4 = tpu.matmul %0, %3, %cst {dimension_numbers = #tpu.dot_dimension_numbers<[1], [0], [0], [1], [0, 0, 1, 1], [], []>} : vector<4x64xf32>, vector<64x256xf32>, vector<4x256xf32> -> vector<4x256xf32>
    %5 = vector.broadcast %1 : vector<4x1xf32> to vector<4x256xf32>
    %6 = arith.addf %4, %5 : vector<4x256xf32>
    %c0_6 = arith.constant 0 : index
    %c0_7 = arith.constant 0 : index
    %c0_8 = arith.constant 0 : index
    %7 = vector.load %arg5[%c0_6, %c0_7, %c0_8] : memref<1x4x256xf32, #tpu.memory_space<vmem>>, vector<1x4x256xf32>
    %8 = vector.shape_cast %7 : vector<1x4x256xf32> to vector<4x256xf32>
    %9 = vector.shape_cast %6 : vector<4x256xf32> to vector<1x4x256xf32>
    tpu.vector_store %arg5[%c0_6, %c0_7, %c0_8], %9 {strides = array<i32>} : memref<1x4x256xf32, #tpu.memory_space<vmem>>, vector<1x4x256xf32>,
    return
  }
  func.func @transform_0(%arg0: i32, %arg1: i32) -> (i32, i32, i32) {
    %c0_i32 = arith.constant 0 : i32
    %c0_i32_0 = arith.constant 0 : i32
    return %arg0, %c0_i32, %arg1 : i32, i32, i32
  }
  func.func @transform_1(%arg0: i32, %arg1: i32) -> (i32, i32) {
    %c0_i32 = arith.constant 0 : i32
    %c0_i32_0 = arith.constant 0 : i32
    %c0_i32_1 = arith.constant 0 : i32
    return %c0_i32, %c0_i32_0 : i32, i32
  }
  func.func @transform_2(%arg0: i32, %arg1: i32) -> (i32, i32) {
    %c0_i32 = arith.constant 0 : i32
    %c0_i32_0 = arith.constant 0 : i32
    %c0_i32_1 = arith.constant 0 : i32
    return %c0_i32, %c0_i32_0 : i32, i32
  }
  func.func @transform_3(%arg0: i32, %arg1: i32) -> (i32, i32, i32) {
    %c0_i32 = arith.constant 0 : i32
    %c0_i32_0 = arith.constant 0 : i32
    return %arg0, %c0_i32, %arg1 : i32, i32, i32
  }
}

</mosaic_0001>

<bundles_post_ra>
// kernel: class_head_forward.1
= control target key start
LH: loop header
LB: loop body
LE: loop exit
PB: predicated region body
PF: predicated region fallthrough
CT: control target
= control target key end

     0   :  { %s503_s12 = smov 0   ;;  %s505_s13 = smov 0   ;;  %s546_s0 = inlined_call_operand.vmem [shape: f32[2,64,256], index: 0, kind: input, shape index: {}]   ;;  %s547_s1 = inlined_call_operand.vmem [shape: f32[4,64], index: 1, kind: input, shape index: {}]   ;;  %s548_s2 = inlined_call_operand.vmem [shape: f32[4,1], index: 2, kind: input, shape index: {}]   ;;  %s549_s3 = inlined_call_operand.vmem [shape: f32[2,4,256], index: 3, kind: output, shape index: {}]  }
   0x1   :  { %s507_s14 = smov 0  }
   0x2 LB: > { %s25_s15 = sadd.s32 1, %s475_s13  ;;  %p404_p0 = scmp.ge.s32.totalorder %s479_s14, 1  ;;  %s479_s14 = sphi %s507_s14, %s13_s14   ;;  %s475_s13 = sphi %s505_s13, %s551_s13   ;;  %s471_s12 = sphi %s503_s12, %s550_s12  }
   0x3   : > { %p27_p1 = scmp.ge.s32.totalorder %s25_s15, 2  ;;  %p158_p2 = scmp.lt.s32.totalorder %s479_s14, 3 }
   0x5   : > { %s553_s15 = smov (%p27_p1, %s25_s15), 0  ;;  %p159_p3 = pnand %p404_p0, %p158_p2 }
   0x6   : > { %p191_p4 = scmp.lt.s32.totalorder (!%p159_p3), %s471_s12, 1  ;;  %v481_v0 = vmov (!%p159_p3), 0.0   ;;  %v482_v1 = vmov (!%p159_p3), 0   ;;  %v211_v2 = vld [vmem:[%s548_s2] sm:$0xf] (!%p159_p3)  ;;  %vm233_vm0 = vcmask (!%p159_p3), 523264  }
   0x7   : > { %162 = sbr.rel (%p159_p3) target bundleno = 254 (0xfe), region = 32  ;;  %301 = vmatprep.mubr.f32.mxu0 (!%p159_p3), %v481_v0  ;;  %456 = vset.pattern.permute.xlu0 (!%p159_p3), %v482_v1  ;;  %v210_v27 = vld [vmem:[%s547_s1] sm:$0xf] (!%p159_p3) }
   0x8   : > { %230 = vperm.xlu0 (!%p159_p3), %456, %v211_v2  }
   0xe   : > { %s555_s12 = smov (!%p191_p4, %s471_s12), 1 }
   0xf   : > { %s412_s18 = sshll.u32 %s555_s12, 7  ;;  %s413_s24 = sshll.u32 %s555_s12, 3 }
  0x10   : > { %s198_s21 = scalar_lea.vmem %s546_s0, %s412_s18  ;;  %s208_s27 = scalar_lea.vmem %s549_s3, %s413_s24 }
  0x11   : > { %v213_v3 = vld [vmem:[%s198_s21 + $0x8] sm:$0xff]  ;;  %v215_v4 = vld [vmem:[%s198_s21 + $0x18] sm:$0xff]  ;;  %v212_v5 = vld [vmem:[%s198_s21] sm:$0xff] }
  0x12   : > { %v414_v6 = vpack.c.bf16 %v215_v4, %v213_v3  ;;  %v214_v7 = vld [vmem:[%s198_s21 + $0x10] sm:$0xff]  ;;  %v217_v8 = vld [vmem:[%s198_s21 + $0x28] sm:$0xff]  ;;  %v219_v9 = vld [vmem:[%s198_s21 + $0x38] sm:$0xff] }
  0x13   : > { %v416_v10 = vpack.c.bf16 %v214_v7, %v212_v5  ;;  %v418_v11 = vpack.c.bf16 %v219_v9, %v217_v8  ;;  %v216_v12 = vld [vmem:[%s198_s21 + $0x20] sm:$0xff]  ;;  %v218_v13 = vld [vmem:[%s198_s21 + $0x30] sm:$0xff]  ;;  %v221_v14 = vld [vmem:[%s198_s21 + $0x48] sm:$0xff] }
  0x14   : > { %415 = vmatprep.subr.bf16.mxu0 %v414_v6  ;;  %v223_v15 = vld [vmem:[%s198_s21 + $0x58] sm:$0xff]  ;;  %v420_v16 = vpack.c.bf16 %v218_v13, %v216_v12  ;;  %v220_v18 = vld [vmem:[%s198_s21 + $0x40] sm:$0xff]  ;;  %v222_v19 = vld [vmem:[%s198_s21 + $0x50] sm:$0xff] }
  0x15   : > { %417 = vmatpush1.bf16.msra.mxu0 %v416_v10  ;;  %v422_v17 = vpack.c.bf16 %v223_v15, %v221_v14  ;;  %v225_v20 = vld [vmem:[%s198_s21 + $0x68] sm:$0xff]  ;;  %v227_v21 = vld [vmem:[%s198_s21 + $0x78] sm:$0xff]  ;;  %v424_v22 = vpack.c.bf16 %v222_v19, %v220_v18  ;;  %v224_v24 = vld [vmem:[%s198_s21 + $0x60] sm:$0xff] }
  0x16   : > { %419 = vmatprep.subr.bf16.mxu0 %v418_v11  ;;  %v426_v23 = vpack.c.bf16 %v227_v21, %v225_v20  ;;  %v226_v25 = vld [vmem:[%s198_s21 + $0x70] sm:$0xff] }
  0x17   : > { %v428_v26 = vpack.c.bf16 %v226_v25, %v224_v24 }
  0x19   : > { %421 = vmatpush1.bf16.msra.mxu0 %v420_v16 }
  0x1a   : > { %423 = vmatprep.subr.bf16.mxu0 %v422_v17 }
  0x1d   : > { %425 = vmatpush1.bf16.msra.mxu0 %v424_v22 }
  0x1e   : > { %427 = vmatprep.subr.bf16.mxu0 %v426_v23 }
  0x21   : > { %429 = vmatpush1.bf16.msra.mxu0 %v428_v26 }
  0x24   : > { %409 = vmatmul.mubr.msk.f32.vlgmr.msra.gmra.mrb[0].mxu0 %vm233_vm0, %v210_v27 }
  0x87   : > { %v231_v28 = vpop.permute.xlu0 %230 }
  0xf7   : > { %v303_v29 = vpop.f32.mrb[0].mxu0 }
  0xf8   : > { %v304_v30 = vadd.f32 %v303_v29, %v231_v28  ;;  %v305_v31 = vpop.f32.mrb[1].mxu0 }
  0xf9   : > { %v306_v32 = vadd.f32 %v305_v31, %v231_v28 }
  0xfb   : > { %v310_v33 = vcombine.low %v304_v30, %v306_v32 }
  0xfd   : > { %312 = vst [vmem:[%s208_s27] sm:$0xff] %v310_v33 }
  0xfe PF: > { %s13_s14 = sadd.s32 1, %s479_s14   ;;  %s550_s12 = smov %s475_s13 }
  0xff   : > { %p10_p5 = scmp.ge.s32.totalorder %s13_s14, 4   ;;  %s551_s13 = smov %s553_s15 }
 0x101   :  { %12 = sbr.rel (!%p10_p5) target bundleno = 2 (0x2), region = 62 }

</bundles_post_ra>
